<compile_context>
chip_gen: v5e
topology: v5e:2x2
jax: 0.10.0
libtpu: 0.0.40
codegen_flags: <defaults>
</compile_context>

<pallas_src>
import functools

import jax
import jax.numpy as jnp
from jax import lax
from jax.experimental import pallas as pl
from jax.experimental.pallas import tpu as pltpu

NUM_CLASSES = 2
DEFAULT_ALPHA = 0.9
DEFAULT_MAX_TILE_N = 4096   # samples per grid step (multiple of 128)


def _log_softmax2(logits_ref):
    """Given a (2, TN) logits block, return (logp0, logp1), each (1, TN)."""
    x0 = logits_ref[0:1, :]
    x1 = logits_ref[1:2, :]
    d = x1 - x0
    # stable softplus(d) = max(d, 0) + log(1 + exp(-|d|))
    sp = jnp.maximum(d, 0.0) + jnp.log(1.0 + jnp.exp(-jnp.abs(d)))
    return -sp, d - sp                       # log p0, log p1


def _mask_pad(sw, masked, tn, n_actual):
    """Zero the sample weight of padded lanes (only emitted when needed)."""
    if not masked:
        return sw
    lane = lax.broadcasted_iota(jnp.int32, (1, tn), 1)
    valid = (pl.program_id(0) * tn + lane) < n_actual
    return jnp.where(valid, sw, 0.0)


def _write_partials(part_ref, num, den):
    """Write scalar partial sums into an (8, 128) block: [0,0]=num, [0,1]=den."""
    row = lax.broadcasted_iota(jnp.int32, (8, 128), 0)
    lane = lax.broadcasted_iota(jnp.int32, (8, 128), 1)
    part_ref[...] = jnp.where((row == 0) & (lane == 0), num,
                              jnp.where((row == 0) & (lane == 1), den, 0.0))


def _onehot_kernel(n_actual, masked, logits_ref, labels_ref, newt_ref, part_ref):
    """epoch <= 15: targets are one-hot; t_prev is never read."""
    tn = logits_ref.shape[1]
    logp0, logp1 = _log_softmax2(logits_ref)

    labels = labels_ref[...]                               # (1, TN) int32
    oh0 = (labels == 0).astype(jnp.float32)
    oh1 = 1.0 - oh0

    ce = -(oh0 * logp0 + oh1 * logp1)                      # (1, TN)
    sw = _mask_pad(jnp.maximum(oh0, oh1), masked, tn, n_actual)

    num = jnp.sum(sw * ce)
    den = jnp.sum(sw)

    newt_ref[0:1, :] = oh0
    newt_ref[1:2, :] = oh1
    _write_partials(part_ref, num, den)


def _blend_kernel(n_actual, masked, alpha, logits_ref, tprev_ref, newt_ref, part_ref):
    """epoch > 15: targets are EMA blend of previous soft targets and softmax."""
    tn = logits_ref.shape[1]
    logp0, logp1 = _log_softmax2(logits_ref)
    p0 = jnp.exp(logp0)
    p1 = jnp.exp(logp1)

    yt0 = alpha * tprev_ref[0:1, :] + (1.0 - alpha) * p0
    yt1 = alpha * tprev_ref[1:2, :] + (1.0 - alpha) * p1

    ce = -(yt0 * logp0 + yt1 * logp1)
    sw = _mask_pad(jnp.maximum(yt0, yt1), masked, tn, n_actual)

    num = jnp.sum(sw * ce)
    den = jnp.sum(sw)

    newt_ref[0:1, :] = yt0
    newt_ref[1:2, :] = yt1
    _write_partials(part_ref, num, den)


def _common_call(kernel, in_arrays, in_specs, n_pad, tn):
    num_tiles = n_pad // tn
    newt, parts = pl.pallas_call(
        kernel,
        grid=(num_tiles,),
        in_specs=in_specs,
        out_specs=(
            pl.BlockSpec((2, tn), lambda i: (0, i)),       # new soft targets [2, N]
            pl.BlockSpec((8, 128), lambda i: (i, 0)),      # per-tile partial sums
        ),
        out_shape=(
            jax.ShapeDtypeStruct((2, n_pad), jnp.float32),
            jax.ShapeDtypeStruct((num_tiles * 8, 128), jnp.float32),
        ),
        compiler_params=pltpu.CompilerParams(
            dimension_semantics=("parallel",)),            # tiles are independent
    )(*in_arrays)
    # Final reduce + divide in the wrapper (rows other than row 0 of each 8-row
    # partial block are zero, so summing whole columns is exact).
    loss = jnp.sum(parts[:, 0]) / jnp.sum(parts[:, 1])
    return loss, newt


@functools.partial(jax.jit, static_argnums=(2, 3))
def _call_onehot(logits_t, labels2, n_actual, tn):
    n_pad = logits_t.shape[1]
    masked = n_pad != n_actual
    kernel = functools.partial(_onehot_kernel, n_actual, masked)
    in_specs = (
        pl.BlockSpec((2, tn), lambda i: (0, i)),           # logits  [2, N]
        pl.BlockSpec((1, tn), lambda i: (0, i)),           # labels  [1, N]
    )
    return _common_call(kernel, (logits_t, labels2), in_specs, n_pad, tn)


@functools.partial(jax.jit, static_argnums=(2, 3, 4))
def _call_blend(logits_t, tprev_t, n_actual, tn, alpha):
    n_pad = logits_t.shape[1]
    masked = n_pad != n_actual
    kernel = functools.partial(_blend_kernel, n_actual, masked, float(alpha))
    in_specs = (
        pl.BlockSpec((2, tn), lambda i: (0, i)),           # logits  [2, N]
        pl.BlockSpec((2, tn), lambda i: (0, i)),           # t_prev  [2, N]
    )
    return _common_call(kernel, (logits_t, tprev_t), in_specs, n_pad, tn)


def _tile_n(n, max_tile):
    """Pick a lane-tile size (multiple of 128) and padded N."""
    n128 = ((max(n, 1) + 127) // 128) * 128
    tn = max(128, (min(max_tile, n128) // 128) * 128)
    n_pad = ((n128 + tn - 1) // tn) * tn
    return tn, n_pad


def _pad_last(x, n_pad):
    pad = n_pad - x.shape[-1]
    if pad == 0:
        return x
    widths = [(0, 0)] * (x.ndim - 1) + [(0, pad)]
    return jnp.pad(x, widths)


class SelfAdaptLoss:
    """Host-side wrapper mirroring the PyTorch module's stateful behaviour.

    Soft targets are kept (host dict keyed by `fn`) in the lane-dense [2, N]
    layout so they can be fed straight back into the blend kernel.
    """

    def __init__(self, alpha=DEFAULT_ALPHA, max_tile_n=DEFAULT_MAX_TILE_N):
        self.alpha = float(alpha)
        self.max_tile_n = int(max_tile_n)
        self.t_true_dict = {}   # TODO(synk): per-sample target cache is host-side Python state

    def __call__(self, y_pred_logits, y_true_labels, epoch, fn):
        n = y_pred_logits.shape[0]
        tn, n_pad = _tile_n(n, self.max_tile_n)

        logits_t = _pad_last(jnp.asarray(y_pred_logits, jnp.float32).T, n_pad)  # [2, N]

        use_blend = (epoch > 15) and (fn in self.t_true_dict)
        if use_blend:
            tprev_t = _pad_last(jnp.asarray(self.t_true_dict[fn], jnp.float32), n_pad)
            loss, newt = _call_blend(logits_t, tprev_t, n, tn, self.alpha)
        else:
            labels2 = _pad_last(
                jnp.asarray(y_true_labels, jnp.int32).reshape(1, n), n_pad)
            loss, newt = _call_onehot(logits_t, labels2, n, tn)

        self.t_true_dict[fn] = newt[:, :n]   # store lane-dense [2, N]
        return loss

    def get_targets(self, fn):
        """Return stored soft targets in the original [N, 2] layout."""
        return self.t_true_dict[fn].T


def _reference_loss(logits, labels, alpha, t_prev, use_blend):
    """Pure-JAX reference mirroring the PyTorch forward for verification."""
    probs = jax.nn.softmax(logits, axis=-1)
    if use_blend:
        y_true = alpha * t_prev + (1.0 - alpha) * probs
    else:
        y_true = jax.nn.one_hot(labels, NUM_CLASSES, dtype=jnp.float32)
    sample_weight = jnp.max(y_true, axis=1)
    loss = -y_true * jnp.log(probs)
    loss = sample_weight * loss.sum(-1)
    return loss.sum() / sample_weight.sum(), y_true


if __name__ == "__main__":
    key = jax.random.PRNGKey(0)
    k1, k2 = jax.random.split(key)

    N = 300   # not a multiple of 128 -> exercises padding; tile=128 -> 3 grid steps
    logits = jax.random.normal(k1, (N, NUM_CLASSES), dtype=jnp.float32)
    labels = jax.random.randint(k2, (N,), 0, NUM_CLASSES, dtype=jnp.int32)

    loss_fn = SelfAdaptLoss(alpha=DEFAULT_ALPHA, max_tile_n=128)

    # epoch <= 15: hard one-hot targets
    loss_early = loss_fn(logits, labels, epoch=3, fn="sample_0")
    jax.block_until_ready(loss_early)
    ref_early, ref_t = _reference_loss(logits, labels, DEFAULT_ALPHA, None, False)
    assert jnp.allclose(loss_early, ref_early, rtol=1e-5, atol=1e-6), (
        loss_early, ref_early)
    assert jnp.allclose(loss_fn.get_targets("sample_0"), ref_t, atol=1e-6)

    # epoch > 15: EMA blend with previously stored soft targets
    loss_late = loss_fn(logits, labels, epoch=20, fn="sample_0")
    jax.block_until_ready(loss_late)
    ref_late, ref_t2 = _reference_loss(logits, labels, DEFAULT_ALPHA, ref_t, True)
    assert jnp.allclose(loss_late, ref_late, rtol=1e-5, atol=1e-6), (
        loss_late, ref_late)
    assert jnp.allclose(loss_fn.get_targets("sample_0"), ref_t2, atol=1e-5)

    print("KERNEL_OK")
</pallas_src>

<mosaic_0001>
module attributes {stable_mosaic.version = 11 : i64} {
  func.func @_onehot_kernel(%arg0: i32, %arg1: memref<2x128xf32, #tpu.memory_space<vmem>>, %arg2: memref<1x128xi32, #tpu.memory_space<vmem>>, %arg3: memref<2x128xf32, #tpu.memory_space<vmem>>, %arg4: memref<8x128xf32, #tpu.memory_space<vmem>>) attributes {dimension_semantics = [#tpu.dimension_semantics<parallel>], iteration_bounds = array<i64: 3>, scalar_prefetch = 0 : i64, scratch_operands = 0 : i64, tpu.core_type = #tpu.core_type<tc>, window_params = [{transform_indices = @transform_0, window_bounds = array<i64: 2, 128>}, {transform_indices = @transform_1, window_bounds = array<i64: 1, 128>}, {transform_indices = @transform_2, window_bounds = array<i64: 2, 128>}, {transform_indices = @transform_3, window_bounds = array<i64: 8, 128>}]} {
    %c0 = arith.constant 0 : index
    %c0_0 = arith.constant 0 : index
    %0 = vector.load %arg1[%c0, %c0_0] : memref<2x128xf32, #tpu.memory_space<vmem>>, vector<1x128xf32>
    %c1 = arith.constant 1 : index
    %c0_1 = arith.constant 0 : index
    %1 = vector.load %arg1[%c1, %c0_1] : memref<2x128xf32, #tpu.memory_space<vmem>>, vector<1x128xf32>
    %2 = arith.subf %1, %0 : vector<1x128xf32>
    %cst = arith.constant 0.000000e+00 : f32
    %3 = vector.broadcast %cst : f32 to vector<1x128xf32>
    %4 = arith.maximumf %2, %3 : vector<1x128xf32>
    %5 = math.absf %2 : vector<1x128xf32>
    %cst_2 = arith.constant 0.000000e+00 : f32
    %6 = vector.broadcast %cst_2 : f32 to vector<1x128xf32>
    %7 = arith.subf %6, %5 : vector<1x128xf32>
    %8 = math.exp %7 : vector<1x128xf32>
    %cst_3 = arith.constant 1.000000e+00 : f32
    %9 = vector.broadcast %cst_3 : f32 to vector<1x128xf32>
    %10 = arith.addf %9, %8 : vector<1x128xf32>
    %11 = math.log %10 : vector<1x128xf32>
    %12 = arith.addf %4, %11 : vector<1x128xf32>
    %cst_4 = arith.constant 0.000000e+00 : f32
    %13 = vector.broadcast %cst_4 : f32 to vector<1x128xf32>
    %14 = arith.subf %13, %12 : vector<1x128xf32>
    %15 = arith.subf %2, %12 : vector<1x128xf32>
    %c0_5 = arith.constant 0 : index
    %c0_6 = arith.constant 0 : index
    %16 = vector.load %arg2[%c0_5, %c0_6] : memref<1x128xi32, #tpu.memory_space<vmem>>, vector<1x128xi32>
    %c0_i32 = arith.constant 0 : i32
    %17 = vector.broadcast %c0_i32 : i32 to vector<1x128xi32>
    %18 = arith.cmpi eq, %16, %17 : vector<1x128xi32>
    %19 = arith.extui %18 : vector<1x128xi1> to vector<1x128xi32>
    %20 = arith.sitofp %19 : vector<1x128xi32> to vector<1x128xf32>
    %cst_7 = arith.constant 1.000000e+00 : f32
    %21 = vector.broadcast %cst_7 : f32 to vector<1x128xf32>
    %22 = arith.subf %21, %20 : vector<1x128xf32>
    %23 = arith.mulf %20, %14 : vector<1x128xf32>
    %24 = arith.mulf %22, %15 : vector<1x128xf32>
    %25 = arith.addf %23, %24 : vector<1x128xf32>
    %cst_8 = arith.constant 0.000000e+00 : f32
    %26 = vector.broadcast %cst_8 : f32 to vector<1x128xf32>
    %27 = arith.subf %26, %25 : vector<1x128xf32>
    %28 = arith.maximumf %20, %22 : vector<1x128xf32>
    %29 = tpu.iota {dimensions = array<i32: 1>} : vector<1x128xi32>
    %c128_i32 = arith.constant 128 : i32
    %30 = arith.muli %arg0, %c128_i32 : i32
    %31 = vector.broadcast %30 : i32 to vector<1x128xi32>
    %32 = arith.addi %31, %29 : vector<1x128xi32>
    %c300_i32 = arith.constant 300 : i32
    %33 = vector.broadcast %c300_i32 : i32 to vector<1x128xi32>
    %34 = arith.cmpi slt, %32, %33 : vector<1x128xi32>
    %cst_9 = arith.constant 0.000000e+00 : f32
    %35 = vector.broadcast %cst_9 : f32 to vector<1x128xf32>
    %36 = arith.select %34, %28, %35 : vector<1x128xi1>, vector<1x128xf32>
    %37 = arith.mulf %36, %27 : vector<1x128xf32>
    %38 = vector.shape_cast %37 : vector<1x128xf32> to vector<1x1x128xf32>
    %cst_10 = arith.constant dense<0.000000e+00> : vector<1xf32>
    %39 = vector.multi_reduction <add>, %38, %cst_10 [1, 2] : vector<1x1x128xf32> to vector<1xf32>
    %40 = vector.shape_cast %39 : vector<1xf32> to vector<1x1x1xf32>
    %41 = vector.extract %40[0, 0, 0] : f32 from vector<1x1x1xf32>
    %42 = vector.shape_cast %36 : vector<1x128xf32> to vector<1x1x128xf32>
    %cst_11 = arith.constant dense<0.000000e+00> : vector<1xf32>
    %43 = vector.multi_reduction <add>, %42, %cst_11 [1, 2] : vector<1x1x128xf32> to vector<1xf32>
    %44 = vector.shape_cast %43 : vector<1xf32> to vector<1x1x1xf32>
    %45 = vector.extract %44[0, 0, 0] : f32 from vector<1x1x1xf32>
    %c0_12 = arith.constant 0 : index
    %c0_13 = arith.constant 0 : index
    %46 = vector.load %arg3[%c0_12, %c0_13] : memref<2x128xf32, #tpu.memory_space<vmem>>, vector<1x128xf32>
    tpu.vector_store %arg3[%c0_12, %c0_13], %20 {strides = array<i32>} : memref<2x128xf32, #tpu.memory_space<vmem>>, vector<1x128xf32>,
    %c1_14 = arith.constant 1 : index
    %c0_15 = arith.constant 0 : index
    %47 = vector.load %arg3[%c1_14, %c0_15] : memref<2x128xf32, #tpu.memory_space<vmem>>, vector<1x128xf32>
    tpu.vector_store %arg3[%c1_14, %c0_15], %22 {strides = array<i32>} : memref<2x128xf32, #tpu.memory_space<vmem>>, vector<1x128xf32>,
    %48 = tpu.iota {dimensions = array<i32: 0>} : vector<8x128xi32>
    %49 = tpu.iota {dimensions = array<i32: 1>} : vector<8x128xi32>
    %c0_i32_16 = arith.constant 0 : i32
    %50 = vector.broadcast %c0_i32_16 : i32 to vector<8x128xi32>
    %51 = arith.cmpi eq, %48, %50 : vector<8x128xi32>
    %c0_i32_17 = arith.constant 0 : i32
    %52 = vector.broadcast %c0_i32_17 : i32 to vector<8x128xi32>
    %53 = arith.cmpi eq, %49, %52 : vector<8x128xi32>
    %54 = arith.andi %51, %53 : vector<8x128xi1>
    %c0_i32_18 = arith.constant 0 : i32
    %55 = vector.broadcast %c0_i32_18 : i32 to vector<8x128xi32>
    %56 = arith.cmpi eq, %48, %55 : vector<8x128xi32>
    %c1_i32 = arith.constant 1 : i32
    %57 = vector.broadcast %c1_i32 : i32 to vector<8x128xi32>
    %58 = arith.cmpi eq, %49, %57 : vector<8x128xi32>
    %59 = arith.andi %56, %58 : vector<8x128xi1>
    %cst_19 = arith.constant 0.000000e+00 : f32
    %60 = vector.broadcast %45 : f32 to vector<8x128xf32>
    %61 = vector.broadcast %cst_19 : f32 to vector<8x128xf32>
    %62 = arith.select %59, %60, %61 : vector<8x128xi1>, vector<8x128xf32>
    %63 = vector.broadcast %41 : f32 to vector<8x128xf32>
    %64 = arith.select %54, %63, %62 : vector<8x128xi1>, vector<8x128xf32>
    %c0_20 = arith.constant 0 : index
    %c0_21 = arith.constant 0 : index
    %65 = vector.load %arg4[%c0_20, %c0_21] : memref<8x128xf32, #tpu.memory_space<vmem>>, vector<8x128xf32>
    tpu.vector_store %arg4[%c0_20, %c0_21], %64 {strides = array<i32>} : memref<8x128xf32, #tpu.memory_space<vmem>>, vector<8x128xf32>,
    return
  }
  func.func @transform_0(%arg0: i32) -> (i32, i32) {
    %c0_i32 = arith.constant 0 : i32
    %c0_i32_0 = arith.constant 0 : i32
    return %c0_i32, %arg0 : i32, i32
  }
  func.func @transform_1(%arg0: i32) -> (i32, i32) {
    %c0_i32 = arith.constant 0 : i32
    %c0_i32_0 = arith.constant 0 : i32
    return %c0_i32, %arg0 : i32, i32
  }
  func.func @transform_2(%arg0: i32) -> (i32, i32) {
    %c0_i32 = arith.constant 0 : i32
    %c0_i32_0 = arith.constant 0 : i32
    return %c0_i32, %arg0 : i32, i32
  }
  func.func @transform_3(%arg0: i32) -> (i32, i32) {
    %c0_i32 = arith.constant 0 : i32
    %c0_i32_0 = arith.constant 0 : i32
    return %arg0, %c0_i32 : i32, i32
  }
}

</mosaic_0001>

<bundles_post_ra>
// kernel: _call_onehot.1
= control target key start
LH: loop header
LB: loop body
LE: loop exit
PB: predicated region body
PF: predicated region fallthrough
CT: control target
= control target key end

     0   :  { %9 = vsyncpa [#allocation3], 0  ;;  %s843_s0 = inlined_call_operand.hbm [shape: f32[2,384], index: 0, kind: input, shape index: {}]   ;;  %s844_s1 = inlined_call_operand.hbm [shape: s32[1,384], index: 1, kind: input, shape index: {}]   ;;  %s845_s2 = inlined_call_operand.hbm [shape: f32[2,384], index: 2, kind: output, shape index: {0}]   ;;  %s846_s3 = inlined_call_operand.vmem [shape: f32[24,128], index: 3, kind: output, shape index: {1}]  }
   0x1   :  { %11 = vsyncpa [#allocation3 + $0x1], 0 }
   0x2   :  { %12 = vsyncpa [#allocation6], 0 }
   0x3   :  { %14 = vsyncpa [#allocation6 + $0x1], 0 }
   0x4   :  { %15 = vsyncpa [#allocation4], 0 }
   0x5   :  { %17 = vsyncpa [#allocation4 + $0x1], 0  ;;  %s665_s12 = smov 0   ;;  %s667_s13 = smov 0  }
   0x6   :  { %s669_s14 = smov 0   ;;  %s671_s15 = smov 0  }
   0x7 LB: > { %s686_s16 = sadd.s32 4294967295, %s642_s15   ;;  %s437_s17 = sadd.s32 4294967294, %s642_s15   ;;  %s642_s15 = sphi %s671_s15, %s856_s15   ;;  %s638_s14 = sphi %s669_s14, %s855_s14   ;;  %s634_s13 = sphi %s667_s13, %s854_s13   ;;  %s630_s12 = sphi %s665_s12, %s853_s12  }
   0x8   : > { %s690_s18 = sadd.s32 1, %s642_s15   ;;  %s30_s19 = sadd.s32 1, %s638_s14 }
   0x9   : > { %s27_s20 = ssub.s32 %s642_s15, %s690_s18  ;;  %p37_p0 = scmp.ne.s32.totalorder %s638_s14, %s634_s13 }
   0xa   : > { %p28_p1 = scmp.eq.s32.totalorder %s27_s20, 0  ;;  %p38_p2 = scmp.eq.s32.totalorder %s642_s15, 0 }
   0xb   : > { %p43_p3 = scmp.ne.s32.totalorder %s634_s13, %s630_s12  ;;  %p44_p4 = scmp.eq.s32.totalorder %s686_s16, 0 }
   0xc   : > { %s702_s21 = scalar_select %p28_p1, %s638_s14, %s30_s19  }
   0xd   : > { %p704_p5 = por %p38_p2, %p37_p0  ;;  %p708_p6 = por %p44_p4, %p43_p3 }
   0xe   : > { %p93_p7 = scmp.eq.s32.totalorder %s686_s16, 2  ;;  %p99_p8 = scmp.eq.s32.totalorder %s437_s17, 2 }
   0xf   : > { %p473_p9 = scmp.lt.s32.totalorder %s642_s15, 3  ;;  %s723_s26 = sand.u32 1, %s638_s14  }
  0x10   : > { %p714_p10 = por %p93_p7, %p37_p0  ;;  %p718_p11 = por %p99_p8, %p43_p3 }
  0x11   : > { %s441_s27 = sshll.u32 %s642_s15, 1  ;;  %s440_s28 = sshll.u32 %s723_s26, 1 }
  0x12   : > { %s153_s4 = scalar_lea.hbm %s843_s0, %s441_s27  ;;  %s149_s6 = scalar_lea.vmem [#allocation2], %s440_s28 }
  0x13   : > { %s155_s5 = sshll.u32 %s153_s4, 4  ;;  %s157_s7 = sshll.u32 %s149_s6, 4  ;;  %s156_s5 = int_to_ptr.hbm [resolvable:$true] %s155_s5  ;;  %s158_s7 = int_to_ptr.vmem [resolvable:$true] %s157_s7 }
  0x14   : > { %p732_p12 = pnand %p473_p9, %p704_p5  ;;  %p442_p13 = scmp.ge.s32.totalorder %s642_s15, 1 }
  0x15   : > { %p179_p0 = scmp.lt.s32.totalorder %s642_s15, 4  ;;  %s146_s9 = scalar_lea.sflag [#allocation3], %s723_s26 }
  0x16   : > { %s512_s10 = sshra.s32 %s156_s5, 4  ;;  %p516_p2 = pneg %p732_p12  ;;  %s513_s10 = int_to_ptr.hbm [resolvable:$true] %s512_s10 }
  0x17   : > { %s514_s11 = scalar_lea.hbm %s513_s10, 2  ;;  %s519_s20 = scalar_lea.hbm %s843_s0, 6 }
  0x18   : > { %p515_p1 = scmp.ne.s32.totalorder %s513_s10, %s514_s11  ;;  %p520_p5 = scmp.lt.s32.totalorder %s513_s10, %s843_s0 }
  0x19   : > { %p521_p7 = scmp.lt.s32.totalorder %s519_s20, %s514_s11 }
  0x1a   : > { %p517_p3 = pnand %p516_p2, %p515_p1 }
  0x1b   : > { %p522_p8 = por %p521_p7, %p520_p5 }
  0x1c   : > { %p518_p4 = pneg %p517_p3 }
  0x1e   : > { %p523_p9 = pnand %p522_p8, %p518_p4 }
  0x20   : > { %526 = shalt.err (!%p523_p9)
}
  0x21   : > { %465 = dma.hbm_to_vmem [thread:$0]  (!%p732_p12), %s156_s5, 32, %s158_s7, %s146_s9  }
  0x22   : > { %p756_p1 = pnand %p442_p13, %p179_p0  ;;  %s170_s4 = scalar_lea.hbm %s844_s1, %s642_s15 }
  0x23   : > { %s172_s6 = sshll.u32 %s170_s4, 4  ;;  %s167_s10 = scalar_lea.vmem [#allocation5], %s723_s26  ;;  %s173_s6 = int_to_ptr.hbm [resolvable:$true] %s172_s6 }
  0x24   : > { %s174_s11 = sshll.u32 %s167_s10, 4  ;;  %s165_s17 = scalar_lea.sflag [#allocation6], %s723_s26  ;;  %s175_s11 = int_to_ptr.vmem [resolvable:$true] %s174_s11 }
  0x25   : > { %s542_s19 = sshra.s32 %s173_s6, 4  ;;  %s549_s9 = scalar_lea.hbm %s844_s1, 3  ;;  %s543_s19 = int_to_ptr.hbm [resolvable:$true] %s542_s19 }
  0x26   : > { %s544_s20 = scalar_lea.hbm %s543_s19, 1  ;;  %p550_p4 = scmp.lt.s32.totalorder %s543_s19, %s844_s1 }
  0x27   : > { %p545_p3 = scmp.ne.s32.totalorder %s543_s19, %s544_s20  ;;  %p551_p5 = scmp.lt.s32.totalorder %s549_s9, %s544_s20 }
  0x29   : > { %p547_p13 = pnand %p545_p3, %p516_p2  ;;  %p552_p7 = por %p551_p5, %p550_p4 }
  0x2b   : > { %p548_p0 = pneg %p547_p13 }
  0x2d   : > { %p553_p8 = pnand %p552_p7, %p548_p0 }
  0x2f   : > { %556 = shalt.err (!%p553_p8)
}
  0x30   : > { %468 = dma.hbm_to_vmem [thread:$0]  (!%p732_p12), %s173_s6, 16, %s175_s11, %s165_s17  }
  0x31   : > { %183 = sbr.rel (%p756_p1) target bundleno = 287 (0x11f), region = 28  ;;  %s780_s26 = sand.u32 (!%p756_p1), 1, %s634_s13  }
  0x32   : > { %s443_s29 = sshll.u32 (!%p756_p1), %s780_s26, 1  ;;  %s186_s30 = scalar_lea.sflag (!%p756_p1), [#allocation3], %s780_s26 }
  0x33   : > { %s189_s4 = scalar_lea.vmem (!%p756_p1), [#allocation2], %s443_s29 }
  0x36   : > { %617 = dma.done.wait (%p708_p6), %s186_s30, 32  }
  0x37   : > { %619 = vsyncadd (%p708_p6), %s186_s30, 4294967264  ;;  %s196_s8 = scalar_lea.sflag [#allocation6], %s780_s26  ;;  %s198_s28 = scalar_lea.vmem [#allocation5], %s780_s26 }
  0x38   : > { %621 = dma.done.wait (%p708_p6), %s196_s8, 16  }
  0x39   : > { %623 = vsyncadd (%p708_p6), %s196_s8, 4294967280  ;;  %v234_v0 = vld [vmem:[%s189_s4] sm:$0x1]  ;;  %v235_v1 = vld [vmem:[%s189_s4 + $0x1] sm:$0x1]  ;;  %v258_v9 = vlaneseq  ;;  %s447_s6 = sshll.u32 %s686_s16, 7 }
  0x3a   : > { %v236_v2 = vsub.f32 %v235_v1, %v234_v0  ;;  %v248_v8 = vld [vmem:[%s198_s28] sm:$0x1]  ;;  %v644_v13 = vmov 0.0   ;;  %v261_v15 = vstv %s447_s6  ;;  %vm266_vm2 = vcmask 1040384   ;;  %s449_s23 = sshll.u32 %s686_s16, 1  ;;  %s223_s19 = scalar_lea.vmem [#allocation7], %s443_s29 }
  0x3b   : > { %vm249_vm0 = vcmp.eq.s32.totalorder %v248_v8, 0  ;;  %v798_v11 = vand.u32 127, %v258_v9  ;;  %s316_s17 = scalar_lea.hbm %s845_s2, %s449_s23  ;;  %s318_s20 = sshll.u32 %s223_s19, 4  ;;  %s319_s20 = int_to_ptr.vmem [resolvable:$true] %s318_s20 }
  0x3c   : > { %v238_v3 = vand.u32 2147483647, %v236_v2  ;;  %v237_v10 = vmax.f32 %v236_v2, 0.0  ;;  %v446_v14 = vsel %vm249_vm0, 1.0, %v644_v13  ;;  %s320_s5 = sshll.u32 %s316_s17, 4  ;;  %s302_s7 = scalar_lea.sflag [#allocation4], %s780_s26  ;;  %s321_s5 = int_to_ptr.hbm [resolvable:$true] %s320_s5 }
  0x3d   : > { %v252_v18 = vsub.f32 1.0, %v446_v14  ;;  %v262_v19 = vadd.s32 %v261_v15, %v798_v11  ;;  %287 = vst [vmem:[%s223_s19] sm:$0x1] %v446_v14  ;;  %s586_s9 = sshra.s32 %s321_s5, 4  ;;  %s592_s4 = scalar_lea.hbm %s845_s2, 6  ;;  %s587_s9 = int_to_ptr.hbm [resolvable:$true] %s586_s9 }
  0x3e   : > { %v239_v4 = vsub.f32 0.0, %v238_v3  ;;  %s588_s22 = scalar_lea.hbm %s587_s9, 2  ;;  %p593_p9 = scmp.lt.s32.totalorder %s587_s9, %s845_s2 }
  0x3f   : > { %v257_v22 = vmax.f32 %v446_v14, %v252_v18  ;;  %vm263_vm1 = vcmp.lt.s32.totalorder %v262_v19, 300  ;;  %288 = vst [vmem:[%s223_s19 + $0x1] sm:$0x1] %v252_v18  ;;  %p589_p6 = scmp.ne.s32.totalorder %s587_s9, %s588_s22  ;;  %p594_p1 = scmp.lt.s32.totalorder %s592_s4, %s588_s22 }
  0x40   : > { %v240_v5 = vmul.f32 1.442695, %v239_v4 }
  0x41   : > { %v264_v26 = vsel %vm263_vm1, %v257_v22, 0.0  ;;  %p590_p12 = pnand %p589_p6, %p714_p10  ;;  %p595_p3 = por %p594_p1, %p593_p9 }
  0x42   : > { %508 = vpow2.f32 %v240_v5  ;;  %v277_v30 = vsel %vm266_vm2, %v264_v26, 0.0 }
  0x43   : > { %p591_p2 = pneg %p590_p12 }
  0x45   : > { %p596_p13 = pnand %p595_p3, %p591_p2 }
  0x48   : > { %v509_v6 = vpop.eup %508 }
  0x49   : > { %v242_v7 = vadd.f32 1.0, %v509_v6 }
  0x4b   : > { %510 = vlog2.f32 %v242_v7 }
  0x51   : > { %v511_v12 = vpop.eup %510 }
  0x52   : > { %v244_v16 = vmul.f32 0.6931472, %v511_v12 }
  0x54   : > { %v245_v17 = vadd.f32 %v244_v16, %v237_v10 }
  0x56   : > { %v246_v20 = vsub.f32 0.0, %v245_v17  ;;  %v247_v21 = vsub.f32 %v236_v2, %v245_v17 }
  0x58   : > { %v253_v23 = vmul.f32 %v446_v14, %v246_v20  ;;  %v254_v24 = vmul.f32 %v252_v18, %v247_v21 }
  0x5a   : > { %v255_v25 = vadd.f32 %v254_v24, %v253_v23 }
  0x5c   : > { %v256_v27 = vsub.f32 0.0, %v255_v25 }
  0x5e   : > { %v265_v28 = vmul.f32 %v264_v26, %v256_v27 }
  0x60   : > { %v267_v29 = vsel %vm266_vm2, %v265_v28, 0.0 }
  0x61   : > { %268 = vadd.xlane.f32.xlu0 %v267_v29 }
  0x69   : > { %278 = vadd.xlane.f32.xlu0 %v277_v30 }
  0x6a   : > { %599 = shalt.err (!%p596_p13)
}
  0x6b   : > { %460 = dma.vmem_to_hbm [thread:$0]  (%p714_p10), %s319_s20, 32, %s321_s5, %s302_s7   ;;  %v290_v45 = vshrl.u32 %v258_v9, 7  ;;  %vm294_vm4 = vcmp.eq.s32.totalorder %v798_v11, 1  ;;  %vm292_vm5 = vcmp.eq.s32.totalorder %v798_v11, 0 }
  0x6c   : > { %p230_p0 = scmp.lt.s32.totalorder %s686_s16, 2 }
  0x6d   : > { %vm291_vm3 = vcmp.eq.s32.totalorder %v290_v45, 0 }
  0x6e   : > { %s858_s16 = smov (!%p230_p0, %s686_s16), 2  ;;  %vm295_vm6 = vmand %vm291_vm3, %vm294_vm4 }
  0x6f   : > { %s445_s24 = sshll.u32 %s858_s16, 3  ;;  %vm293_vm7 = vmand %vm291_vm3, %vm292_vm5 }
  0x70   : > { %s233_s10 = scalar_lea.vmem %s846_s3, %s445_s24 }
  0xd4   : > { %v269_v31 = vpop.xlane.xlu0 %268 }
  0xd5   : > { %v270_v32 = vrot.slane %v269_v31, 4 }
  0xd7   : > { %v271_v33 = vadd.f32 %v270_v32, %v269_v31 }
  0xd9   : > { %v272_v34 = vrot.slane %v271_v33, 2 }
  0xdb   : > { %v273_v35 = vadd.f32 %v272_v34, %v271_v33 }
  0xdc   : > { %v279_v36 = vpop.xlane.xlu0 %278 }
  0xdd   : > { %v280_v37 = vrot.slane %v279_v36, 4  ;;  %v274_v38 = vrot.slane %v273_v35, 1 }
  0xdf   : > { %v281_v39 = vadd.f32 %v280_v37, %v279_v36  ;;  %v275_v40 = vadd.f32 %v274_v38, %v273_v35 }
  0xe1   : > { %v282_v41 = vrot.slane %v281_v39, 2  ;;  %452 = vpush %v275_v40 }
  0xe3   : > { %v283_v42 = vadd.f32 %v282_v41, %v281_v39 }
  0xe5   : > { %v284_v43 = vrot.slane %v283_v42, 1 }
  0xe7   : > { %v285_v44 = vadd.f32 %v284_v43, %v283_v42 }
  0xe9   : > { %454 = vpush %v285_v44 }
 0x112   : > { %s453_s26 = spop %452 }
 0x113   : > { %v298_v47 = vstv %s453_s26 }
 0x11a   : > { %s455_s28 = spop %454 }
 0x11b   : > { %v296_v46 = vstv %s455_s28 }
 0x11c   : > { %v297_v48 = vsel %vm295_vm6, %v296_v46, 0.0 }
 0x11d   : > { %v299_v49 = vsel %vm293_vm7, %v298_v47, %v297_v48 }
 0x11e   : > { %300 = vst [vmem:[%s233_s10] sm:$0xff] %v299_v49 }
 0x11f PF: > { %p474_p10 = scmp.ge.s32.totalorder %s642_s15, 2  ;;  %s335_s11 = sand.u32 1, %s630_s12  }
 0x120   : > { %s336_s16 = scalar_lea.sflag [#allocation4], %s335_s11 }
 0x121   : > { %p470_p4 = pnand %p474_p10, %p718_p11 }
 0x123   : > { %p471_p5 = pneg %p470_p4 }
 0x125   : > { %625 = dma.done.wait (%p471_p5), %s336_s16, 32  }
 0x126   : > { %627 = vsyncadd (%p471_p5), %s336_s16, 4294967264  ;;  %p20_p7 = scmp.ge.s32.totalorder %s690_s18, 5   ;;  %s853_s12 = smov %s634_s13 }
 0x127   : > { %s854_s13 = smov %s638_s14  ;;  %s855_s14 = smov %s702_s21 }
 0x128   : > { %s856_s15 = smov %s690_s18  ;;  %22 = sbr.rel (!%p20_p7) target bundleno = 7 (0x7), region = 98 }
 0x12d   :  { %349 = vsyncpa [#allocation3], 1 }
 0x12e   :  { %351 = vsyncpa [#allocation3 + $0x1], 1 }
 0x12f   :  { %352 = vsyncpa [#allocation6], 1 }
 0x130   :  { %354 = vsyncpa [#allocation6 + $0x1], 1 }
 0x131   :  { %355 = vsyncpa [#allocation4], 1 }
 0x132   :  { %357 = vsyncpa [#allocation4 + $0x1], 1 }

</bundles_post_ra>
